<compile_context>
chip_gen: v7x
topology: tpu7x:2x2x1
jax: 0.10.0
libtpu: 0.0.40
codegen_flags: <defaults>
</compile_context>

<pallas_src>
import functools
import math

import jax
import jax.numpy as jnp
from jax.experimental import pallas as pl
from jax.experimental.pallas import tpu as pltpu


def autopad(k, p=None, d=1):
    """Pad to 'same' shape outputs (mirror of the PyTorch helper)."""
    if d > 1:
        k = d * (k - 1) + 1 if isinstance(k, int) else [d * (x - 1) + 1 for x in k]
    if p is None:
        p = k // 2 if isinstance(k, int) else [x // 2 for x in k]
    return p


def _conv_bn_silu_kernel(x_ref, w_ref, shift_ref, o_ref, xunf_ref, *, k_h, pad):
    """One (batch, output-row strip) tile per grid step.

    x_ref:     (1, H, W*C1)     bf16  whole image, channels collapsed into lanes
    w_ref:     (K*W*C1, Wo*C2)  bf16  fused banded conv weight (BN scale folded in)
    shift_ref: (1, Wo*C2)       f32   folded BN shift, tiled over Wo
    o_ref:     (1, TH, Wo*C2)   bf16  output row strip (lane-dense)
    xunf_ref:  (Ho, K*W*C1)     bf16  scratch: kh-unfolded, vertically padded
                                      image; built once per image, reused by
                                      every strip of that image.
    """
    H, Wc = x_ref.shape[1], x_ref.shape[2]
    Ho = xunf_ref.shape[0]
    TH = o_ref.shape[1]

    # Build the kh-unfolded padded image once per batch image (the strip axis
    # is "arbitrary", so later strips reuse the scratch).  Only the boundary
    # rows of each tap band are zeroed; the interior is a straight bf16 copy
    # (no dtype casts, no full-buffer zero fill).  Horizontal 'same' padding
    # is folded into the banded weight, so no width pad is ever materialized.
    @pl.when(pl.program_id(1) == 0)
    def _():
        for kh in range(k_h):                    # static, small
            dr = kh - pad                        # input row = output row + dr
            lo = max(0, -dr)                     # first output row w/ valid input
            hi = min(Ho, H - dr)                 # one past last valid output row
            c0, c1 = kh * Wc, (kh + 1) * Wc      # lane band of this tap
            if lo > 0:
                xunf_ref[0:lo, c0:c1] = jnp.zeros((lo, Wc), xunf_ref.dtype)
            if hi < Ho:
                xunf_ref[hi:Ho, c0:c1] = jnp.zeros((Ho - hi, Wc), xunf_ref.dtype)
            if hi > lo:
                xunf_ref[lo:hi, c0:c1] = x_ref[0, lo + dr:hi + dr, :]

    # This strip's lhs: TH lane-dense rows of the unfolded image (static slice
    # when the whole output height is a single strip, which is the common case).
    if TH == Ho:
        lhs = xunf_ref[...]
    else:
        r0 = pl.multiple_of(pl.program_id(1) * TH, TH)
        lhs = xunf_ref[pl.ds(r0, TH), :]

    # Whole K*K*C1 receptive field contracted by ONE MXU matmul (depth K*W*C1),
    # f32 accumulation; the result is directly the lane-dense (TH, Wo*C2) strip
    # (no per-tap relayouts, no masked sub-128-lane stores).
    acc = jnp.dot(lhs, w_ref[...], preferred_element_type=jnp.float32)

    # Folded BatchNorm shift (scale already folded into w_ref) + SiLU in f32.
    y = acc + shift_ref[...]
    y = y * jax.nn.sigmoid(y)
    o_ref[0] = y.astype(o_ref.dtype)             # bf16 writeback


def _pick_tile_h(ho, cap=256):
    """Whole Ho as one strip when it fits the cap; otherwise the largest
    multiple-of-8 divisor of Ho that is <= cap (strips only bound VMEM)."""
    if ho <= cap:
        return ho
    th = ho
    while th > cap and th % 2 == 0 and (th // 2) % 8 == 0:
        th //= 2
    return th


def conv_bn_silu(x_nchw, w_oihw, gamma, beta, running_mean, running_var,
                 *, stride=1, padding=None, groups=1, dilation=1, eps=1e-5):
    """Wrapper: NCHW in, NCHW out — matches the PyTorch module's forward()."""
    # TODO(synk): only stride=1, groups=1, dilation=1 (the module defaults) are
    # implemented in-kernel; other configs need a different banded-weight map.
    assert stride == 1 and groups == 1 and dilation == 1
    N, C1, H, W = x_nchw.shape
    C2, _, K, _ = w_oihw.shape
    p = autopad(K, padding, dilation)
    Ho = H + 2 * p - K + 1
    Wo = W + 2 * p - K + 1

    # -------- glue: BN folding + fused banded-weight construction (once) --------
    inv_std = 1.0 / jnp.sqrt(running_var.astype(jnp.float32) + eps)
    scale = gamma.astype(jnp.float32) * inv_std                        # (C2,)
    shift = beta.astype(jnp.float32) - running_mean.astype(jnp.float32) * scale

    w_hwio = jnp.transpose(w_oihw, (2, 3, 1, 0)).astype(jnp.float32)   # (K,K,C1,C2)
    w_scaled = w_hwio * scale[None, None, None, :]                     # fold BN scale

    # Banded weight B[kh, wi*C1+c1, wo*C2+c2] = w[kh, wi-wo+p, c1, c2] when the
    # tap is in range, else 0.  Encodes the kw loop *and* the horizontal 'same'
    # padding, then gets fused over kh into a single (K*W*C1, Wo*C2) matmul rhs.
    wi = jnp.arange(W)[:, None]
    wo = jnp.arange(Wo)[None, :]
    kw = wi - wo + p                                                   # (W, Wo)
    valid = (kw >= 0) & (kw < K)
    band = w_scaled[:, jnp.clip(kw, 0, K - 1), :, :]                   # (K,W,Wo,C1,C2)
    band = jnp.where(valid[None, :, :, None, None], band, 0.0)
    band = jnp.transpose(band, (0, 1, 3, 2, 4))                        # (K,W,C1,Wo,C2)
    w_fused = band.reshape(K * W * C1, Wo * C2).astype(jnp.bfloat16)   # MXU-native
    # TODO(synk): band-tile Wo (per-tile (K*(TWo+K-1)*C1, TWo*C2) bands) before
    # running at large W so the useful-MAC fraction stays ~TWo/(TWo+K-1).

    shift_tiled = jnp.tile(shift, Wo).reshape(1, Wo * C2)              # (1, Wo*C2) f32

    # Activations: NCHW -> (N, H, W*C1), bf16, channels collapsed into lanes.
    x_flat = jnp.transpose(x_nchw, (0, 2, 3, 1)).reshape(N, H, W * C1)
    x_flat = x_flat.astype(jnp.bfloat16)

    # -------- tiling: whole Ho as one strip whenever it fits (grid=(N,1)) ------
    TH = _pick_tile_h(Ho)
    S = Ho // TH
    Wc, No = W * C1, Wo * C2
    # TODO(synk): for large H stream row strips of x with a TH+K-1 halo instead
    # of keeping the whole (1, H, W*C1) image resident; re-derive for v7x 64MiB.

    kernel = functools.partial(_conv_bn_silu_kernel, k_h=K, pad=p)
    out = pl.pallas_call(
        kernel,
        out_shape=jax.ShapeDtypeStruct((N, Ho, No), jnp.bfloat16),
        grid_spec=pltpu.PrefetchScalarGridSpec(
            num_scalar_prefetch=0,
            grid=(N, S),
            in_specs=[
                pl.BlockSpec((1, H, Wc), lambda n, s: (n, 0, 0)),
                # Constant blocks (index maps ignore the grid) -> DMA'd once.
                # TODO(synk): pipeline_mode=pl.Buffered(1) to single-buffer.
                pl.BlockSpec((K * Wc, No), lambda n, s: (0, 0)),
                pl.BlockSpec((1, No), lambda n, s: (0, 0)),
            ],
            out_specs=pl.BlockSpec((1, TH, No), lambda n, s: (n, s, 0)),
            scratch_shapes=[pltpu.VMEM((Ho, K * Wc), jnp.bfloat16)],
        ),
        compiler_params=pltpu.CompilerParams(
            # Batch feeds the two v7x TensorCores; the strip axis is a plain
            # sequential loop (it exists only to bound VMEM for tall images).
            dimension_semantics=("parallel", "arbitrary"),
        ),
    )(x_flat, w_fused, shift_tiled)

    # Lane-dense (N, Ho, Wo*C2) bf16 -> NCHW f32 (module's output layout/dtype).
    # TODO(synk): consumers that accept the lane-dense bf16 layout should skip
    # this transpose (it is an extra full-tensor HBM round trip).
    out = jnp.transpose(out.reshape(N, Ho, Wo, C2), (0, 3, 1, 2))
    return out.astype(jnp.float32)


def _reference(x_nchw, w_oihw, gamma, beta, mean, var, *, eps=1e-5, padding=1):
    """Pure-JAX reference (lax conv) for a correctness sanity check."""
    y = jax.lax.conv_general_dilated(
        x_nchw, w_oihw,
        window_strides=(1, 1),
        padding=[(padding, padding), (padding, padding)],
        dimension_numbers=("NCHW", "OIHW", "NCHW"),
    )
    inv_std = 1.0 / jnp.sqrt(var + eps)
    s = (gamma * inv_std).reshape(1, -1, 1, 1)
    b = (beta - mean * gamma * inv_std).reshape(1, -1, 1, 1)
    y = y * s + b
    return y * jax.nn.sigmoid(y)


if __name__ == "__main__":
    # Module config: Conv(c1=4, c2=8, k=3, s=1) -> autopad p=1, SiLU activation.
    N, C1, H, W = 2, 4, 16, 16
    C2, K = 8, 3

    key = jax.random.PRNGKey(0)
    kx, kw_, kg, kb, km, kv = jax.random.split(key, 6)

    x = jax.random.normal(kx, (N, C1, H, W), jnp.float32)
    # Deterministic Conv2d-style init (kaiming-uniform-ish bound).
    bound = 1.0 / math.sqrt(C1 * K * K)
    w = jax.random.uniform(kw_, (C2, C1, K, K), jnp.float32, -bound, bound)
    # BatchNorm2d parameters / running stats (deterministic, non-trivial).
    gamma = 1.0 + 0.1 * jax.random.normal(kg, (C2,), jnp.float32)
    beta = 0.1 * jax.random.normal(kb, (C2,), jnp.float32)
    running_mean = 0.1 * jax.random.normal(km, (C2,), jnp.float32)
    running_var = 1.0 + 0.1 * jax.random.uniform(kv, (C2,), jnp.float32)

    out = conv_bn_silu(x, w, gamma, beta, running_mean, running_var,
                       stride=1, padding=None)
    out = jax.block_until_ready(out)

    ref = _reference(x, w, gamma, beta, running_mean, running_var, padding=1)
    assert out.shape == (N, C2, H, W)
    # bf16 MXU operands + bf16 writeback with f32 accumulation -> loose tol.
    err = float(jnp.max(jnp.abs(out - ref)))
    assert jnp.allclose(out, ref, atol=3e-2, rtol=3e-2), err

    print("KERNEL_OK")
</pallas_src>

<mosaic_0001>
module attributes {stable_mosaic.version = 11 : i64} {
  func.func @_conv_bn_silu_kernel(%arg0: i32, %arg1: i32, %arg2: memref<1x16x64xbf16, #tpu.memory_space<vmem>>, %arg3: memref<192x128xbf16, #tpu.memory_space<vmem>>, %arg4: memref<1x128xf32, #tpu.memory_space<vmem>>, %arg5: memref<1x16x128xbf16, #tpu.memory_space<vmem>>, %arg6: memref<16x192xbf16, #tpu.memory_space<vmem>>) attributes {dimension_semantics = [#tpu.dimension_semantics<parallel>, #tpu.dimension_semantics<arbitrary>], iteration_bounds = array<i64: 2, 1>, scalar_prefetch = 0 : i64, scratch_operands = 1 : i64, tpu.core_type = #tpu.core_type<tc>, window_params = [{transform_indices = @transform_0, window_bounds = array<i64: 1, 16, 64>}, {pipeline_mode = #tpu.pipeline_mode<synchronous>, transform_indices = @transform_1, window_bounds = array<i64: 192, 128>}, {pipeline_mode = #tpu.pipeline_mode<synchronous>, transform_indices = @transform_2, window_bounds = array<i64: 1, 128>}, {transform_indices = @transform_3, window_bounds = array<i64: 1, 16, 128>}]} {
    %c0_i32 = arith.constant 0 : i32
    %0 = arith.cmpi eq, %arg1, %c0_i32 : i32
    %1 = arith.extui %0 : i1 to i32
    %c0_i32_0 = arith.constant 0 : i32
    %2 = arith.cmpi ne, %1, %c0_i32_0 : i32
    scf.if %2 {
      %cst_10 = arith.constant 0.000000e+00 : bf16
      %19 = vector.broadcast %cst_10 : bf16 to vector<1x64xbf16>
      %c0_11 = arith.constant 0 : index
      %c0_12 = arith.constant 0 : index
      %20 = vector.load %arg6[%c0_11, %c0_12] : memref<16x192xbf16, #tpu.memory_space<vmem>>, vector<1x64xbf16>
      tpu.vector_store %arg6[%c0_11, %c0_12], %19 {strides = array<i32>} : memref<16x192xbf16, #tpu.memory_space<vmem>>, vector<1x64xbf16>,
      %c0_13 = arith.constant 0 : index
      %c0_14 = arith.constant 0 : index
      %c0_15 = arith.constant 0 : index
      %21 = vector.load %arg2[%c0_13, %c0_14, %c0_15] : memref<1x16x64xbf16, #tpu.memory_space<vmem>>, vector<1x15x64xbf16>
      %22 = vector.shape_cast %21 : vector<1x15x64xbf16> to vector<15x64xbf16>
      %c1 = arith.constant 1 : index
      %c0_16 = arith.constant 0 : index
      %23 = vector.load %arg6[%c1, %c0_16] : memref<16x192xbf16, #tpu.memory_space<vmem>>, vector<15x64xbf16>
      tpu.vector_store %arg6[%c1, %c0_16], %22 {strides = array<i32>} : memref<16x192xbf16, #tpu.memory_space<vmem>>, vector<15x64xbf16>,
      %c0_17 = arith.constant 0 : index
      %c0_18 = arith.constant 0 : index
      %c0_19 = arith.constant 0 : index
      %24 = vector.load %arg2[%c0_17, %c0_18, %c0_19] : memref<1x16x64xbf16, #tpu.memory_space<vmem>>, vector<1x16x64xbf16>
      %25 = vector.shape_cast %24 : vector<1x16x64xbf16> to vector<16x64xbf16>
      %c0_20 = arith.constant 0 : index
      %c64 = arith.constant 64 : index
      %26 = vector.load %arg6[%c0_20, %c64] : memref<16x192xbf16, #tpu.memory_space<vmem>>, vector<16x64xbf16>
      tpu.vector_store %arg6[%c0_20, %c64], %25 {strides = array<i32>} : memref<16x192xbf16, #tpu.memory_space<vmem>>, vector<16x64xbf16>,
      %cst_21 = arith.constant 0.000000e+00 : bf16
      %27 = vector.broadcast %cst_21 : bf16 to vector<1x64xbf16>
      %c15 = arith.constant 15 : index
      %c128 = arith.constant 128 : index
      %28 = vector.load %arg6[%c15, %c128] : memref<16x192xbf16, #tpu.memory_space<vmem>>, vector<1x64xbf16>
      tpu.vector_store %arg6[%c15, %c128], %27 {strides = array<i32>} : memref<16x192xbf16, #tpu.memory_space<vmem>>, vector<1x64xbf16>,
      %c0_22 = arith.constant 0 : index
      %c1_23 = arith.constant 1 : index
      %c0_24 = arith.constant 0 : index
      %29 = vector.load %arg2[%c0_22, %c1_23, %c0_24] : memref<1x16x64xbf16, #tpu.memory_space<vmem>>, vector<1x15x64xbf16>
      %30 = vector.shape_cast %29 : vector<1x15x64xbf16> to vector<15x64xbf16>
      %c0_25 = arith.constant 0 : index
      %c128_26 = arith.constant 128 : index
      %31 = vector.load %arg6[%c0_25, %c128_26] : memref<16x192xbf16, #tpu.memory_space<vmem>>, vector<15x64xbf16>
      tpu.vector_store %arg6[%c0_25, %c128_26], %30 {strides = array<i32>} : memref<16x192xbf16, #tpu.memory_space<vmem>>, vector<15x64xbf16>,
    } else {
    }
    %c0 = arith.constant 0 : index
    %c0_1 = arith.constant 0 : index
    %3 = vector.load %arg6[%c0, %c0_1] : memref<16x192xbf16, #tpu.memory_space<vmem>>, vector<16x192xbf16>
    %c0_2 = arith.constant 0 : index
    %c0_3 = arith.constant 0 : index
    %4 = vector.load %arg3[%c0_2, %c0_3] : memref<192x128xbf16, #tpu.memory_space<vmem>>, vector<192x128xbf16>
    %cst = arith.constant dense<0.000000e+00> : vector<16x128xf32>
    %5 = tpu.matmul %3, %4, %cst {dimension_numbers = #tpu.dot_dimension_numbers<[1], [0], [0], [1], [0, 0, 1, 1], [], []>} : vector<16x192xbf16>, vector<192x128xbf16>, vector<16x128xf32> -> vector<16x128xf32>
    %c0_4 = arith.constant 0 : index
    %c0_5 = arith.constant 0 : index
    %6 = vector.load %arg4[%c0_4, %c0_5] : memref<1x128xf32, #tpu.memory_space<vmem>>, vector<1x128xf32>
    %7 = vector.broadcast %6 : vector<1x128xf32> to vector<16x128xf32>
    %8 = arith.addf %5, %7 : vector<16x128xf32>
    %9 = arith.negf %8 : vector<16x128xf32>
    %10 = math.exp %9 : vector<16x128xf32>
    %cst_6 = arith.constant 1.000000e+00 : f32
    %11 = vector.broadcast %cst_6 : f32 to vector<16x128xf32>
    %12 = arith.addf %11, %10 : vector<16x128xf32>
    %13 = arith.divf %11, %12 : vector<16x128xf32>
    %14 = arith.mulf %8, %13 : vector<16x128xf32>
    %15 = arith.truncf %14 : vector<16x128xf32> to vector<16x128xbf16>
    %c0_7 = arith.constant 0 : index
    %c0_8 = arith.constant 0 : index
    %c0_9 = arith.constant 0 : index
    %16 = vector.load %arg5[%c0_7, %c0_8, %c0_9] : memref<1x16x128xbf16, #tpu.memory_space<vmem>>, vector<1x16x128xbf16>
    %17 = vector.shape_cast %16 : vector<1x16x128xbf16> to vector<16x128xbf16>
    %18 = vector.shape_cast %15 : vector<16x128xbf16> to vector<1x16x128xbf16>
    tpu.vector_store %arg5[%c0_7, %c0_8, %c0_9], %18 {strides = array<i32>} : memref<1x16x128xbf16, #tpu.memory_space<vmem>>, vector<1x16x128xbf16>,
    return
  }
  func.func @transform_0(%arg0: i32, %arg1: i32) -> (i32, i32, i32) {
    %c0_i32 = arith.constant 0 : i32
    %c0_i32_0 = arith.constant 0 : i32
    %c0_i32_1 = arith.constant 0 : i32
    return %arg0, %c0_i32, %c0_i32_0 : i32, i32, i32
  }
  func.func @transform_1(%arg0: i32, %arg1: i32) -> (i32, i32) {
    %c0_i32 = arith.constant 0 : i32
    %c0_i32_0 = arith.constant 0 : i32
    %c0_i32_1 = arith.constant 0 : i32
    return %c0_i32, %c0_i32_0 : i32, i32
  }
  func.func @transform_2(%arg0: i32, %arg1: i32) -> (i32, i32) {
    %c0_i32 = arith.constant 0 : i32
    %c0_i32_0 = arith.constant 0 : i32
    %c0_i32_1 = arith.constant 0 : i32
    return %c0_i32, %c0_i32_0 : i32, i32
  }
  func.func @transform_3(%arg0: i32, %arg1: i32) -> (i32, i32, i32) {
    %c0_i32 = arith.constant 0 : i32
    %c0_i32_0 = arith.constant 0 : i32
    return %arg0, %arg1, %c0_i32 : i32, i32, i32
  }
}

</mosaic_0001>

<bundles_post_ra>
// kernel: tpu_custom_call.1
= control target key start
LH: loop header
LB: loop body
LE: loop exit
PB: predicated region body
PF: predicated region fallthrough
CT: control target
= control target key end

     0   :  { %8 = vsyncpa [#allocation4], 0  ;;  %s1150_s0 = inlined_call_operand.hbm [shape: bf16[2,16,64], index: 0, kind: input, shape index: {}]   ;;  %s1151_s1 = inlined_call_operand.hbm [shape: bf16[192,128], index: 1, kind: input, shape index: {}]   ;;  %s1152_s2 = inlined_call_operand.vmem [shape: f32[1,128], index: 2, kind: input, shape index: {}]   ;;  %s1153_s3 = inlined_call_operand.hbm [shape: bf16[2,16,128], index: 3, kind: output, shape index: {}]  }
   0x1   :  { %10 = vsyncpa [#allocation4 + $0x1], 0 }
   0x2   :  { %11 = vsyncpa [#allocation7], 0 }
   0x3   :  { %12 = vsyncpa [#allocation5], 0 }
   0x4   :  { %14 = vsyncpa [#allocation5 + $0x1], 0  ;;  %s895_s12 = smov 0   ;;  %s897_s13 = smov 0  }
   0x5   :  { %s899_s14 = smov 0   ;;  %s901_s15 = smov 0  }
   0x6   :  { %s903_s16 = smov 0   ;;  %s905_s17 = smov 0  }
   0x7 LB: > { %s573_s18 = sadd.s32 4294967295, %s865_s17   ;;  %s574_s19 = sadd.s32 4294967294, %s865_s17   ;;  %s865_s17 = sphi %s905_s17, %s20_s17   ;;  %s861_s16 = sphi %s903_s16, %s1177_s16   ;;  %s857_s15 = sphi %s901_s15, %s1176_s15   ;;  %s853_s14 = sphi %s899_s14, %s1175_s14   ;;  %s849_s13 = sphi %s897_s13, %s1174_s13   ;;  %s845_s12 = sphi %s895_s12, %s1173_s12  }
   0x8   : > { %p52_p0 = scmp.ne.s32.totalorder %s849_s13, %s845_s12  ;;  %p929_p1 = scmp.eq.s32.totalorder %s573_s18, 0 }
   0x9   : > { %p933_p2 = scmp.eq.s32.totalorder %s573_s18, 1  ;;  %p126_p3 = scmp.eq.s32.totalorder %s574_s19, 1 }
   0xa   : > { %s1158_s20 = scalar_select %p929_p1, 1, 0 }
   0xb   : > { %s1159_s21 = scalar_select %p933_p2, 1, 0 }
   0xc   : > { %p939_p4 = por %p929_p1, %p52_p0  ;;  %p575_p5 = scmp.ge.s32.totalorder %s865_s17, 1 }
   0xd   : > { %p944_p6 = por %p126_p3, %p52_p0  ;;  %p133_p7 = scmp.lt.s32.totalorder %s865_s17, 3 }
   0xe   : > { %s1160_s22 = scalar_select %p939_p4, 1, 0 }
   0xf   : > { %s1161_s23 = scalar_select %p944_p6, 1, 0 }
  0x10   : > { %p949_p8 = pnand %p575_p5, %p133_p7  ;;  %s867_s25 = smov [#allocation6]  }
  0x11   : > { %s145_s26 = sshll.u32 %s867_s25, 4  ;;  %s32_s28 = sadd.s32 1, %s861_s16  ;;  %s146_s26 = int_to_ptr.vmem [resolvable:$true] %s145_s26 }
  0x12   : > { %s1162_s24 = scalar_select %p949_p8, 1, 0 }
  0x13   : > { %p628_p9 = pneg %p949_p8  ;;  %s721_s4 = scalar_lea.hbm %s1151_s1, 1536 }
  0x14   : > { %p722_p12 = scmp.ne.s32.totalorder %s1151_s1, %s721_s4  ;;  %p728_p5 = scmp.lt.u32.totalorder %s721_s4, %s1151_s1 }
  0x15   : > { %p958_p11 = pnand %p628_p9, %p929_p1 }
  0x17   : > { %p723_p13 = pneg %p958_p11 }
  0x19   : > { %p724_p0 = pnand %p723_p13, %p722_p12 }
  0x1b   : > { %p725_p3 = pneg %p724_p0 }
  0x1d   : > { %p730_p7 = pnand %p728_p5, %p725_p3 }
  0x1f   : > { %733 = shalt.err (!%p730_p7)
}
  0x20   : > { %s734_s9 = scalar_lea.vmem %s146_s26, 1536  ;;  %p742_p1 = scmp.lt.s32.totalorder %s146_s26, %s146_s26 }
  0x21   : > { %p735_p9 = scmp.ne.s32.totalorder %s146_s26, %s734_s9  ;;  %p743_p4 = scmp.lt.s32.totalorder %s734_s9, %s734_s9 }
  0x23   : > { %p737_p10 = pnand %p735_p9, %p723_p13  ;;  %p744_p8 = por %p743_p4, %p742_p1 }
  0x25   : > { %p738_p6 = pneg %p737_p10 }
  0x27   : > { %p745_p2 = pnand %p744_p8, %p738_p6 }
  0x29   : > { %748 = shalt.err (!%p745_p2)
}
  0x2a   : > { %s868_s10 = smov 64   ;;  %s869_s11 = smov 4  }
  0x2b   : > { %631 = dma.hbm_to_vmem [thread:$0]  (!%p958_p11), %s1151_s1, 1536, %s146_s26, [#allocation7], %s868_s10, %s868_s10, %s869_s11  }
  0x2c   : > { %p34_p1 = scmp.ge.s32.totalorder %s32_s28, 2  ;;  %s39_s25 = sadd.s32 1, %s853_s14 }
  0x2d   : > { %p46_p2 = scmp.ne.s32.totalorder %s853_s14, %s849_s13  ;;  %p47_p4 = scmp.eq.s32.totalorder %s865_s17, 0 }
  0x2e   : > { %s1179_s28 = smov (%p34_p1, %s32_s28), 0  ;;  %p1165_p8 = scmp.ne.s32.totalorder %s1159_s21, 0 }
  0x2f   : > { %p988_p6 = por %p47_p4, %p46_p2  ;;  %s36_s30 = ssub.s32 %s861_s16, %s1179_s28 }
  0x30   : > { %p994_p10 = por %p1165_p8, %p46_p2  ;;  %p641_p12 = scmp.lt.s32.totalorder %s865_s17, 2 }
  0x31   : > { %p37_p11 = scmp.eq.s32.totalorder %s36_s30, 0  ;;  %s162_s26 = sand.u32 1, %s853_s14  }
  0x32   : > { %s578_s4 = sshll.u32 %s162_s26, 3  ;;  %s611_s6 = sshll.u32 %s861_s16, 7 }
  0x33   : > { %s1003_s5 = scalar_select %p37_p11, %s853_s14, %s39_s25  }
  0x34   : > { %s1009_s9 = scalar_lea.hbm %s1150_s0, %s611_s6  ;;  %s166_s21 = scalar_lea.vmem [#allocation3], %s578_s4 }
  0x35   : > { %s173_s18 = sshll.u32 %s166_s21, 4  ;;  %p1015_p13 = pnand %p641_p12, %p988_p6  ;;  %s1011_s18 = int_to_ptr.vmem [resolvable:$true] %s173_s18 }
  0x36   : > { %s1019_s25 = scalar_lea.sflag [#allocation4], %s162_s26  ;;  %s749_s30 = scalar_lea.hbm %s1009_s9, 128 }
  0x37   : > { %p750_p0 = scmp.ne.s32.totalorder %s1009_s9, %s749_s30  ;;  %p751_p3 = pneg %p1015_p13 }
  0x38   : > { %s754_s29 = scalar_lea.hbm %s1150_s0, 256  ;;  %p755_p9 = scmp.lt.u32.totalorder %s1009_s9, %s1150_s0 }
  0x39   : > { %p752_p5 = pnand %p751_p3, %p750_p0  ;;  %p756_p1 = scmp.lt.u32.totalorder %s754_s29, %s749_s30 }
  0x3a   : > { %p758_p4 = scmp.lt.u32.totalorder %s749_s30, %s1009_s9 }
  0x3b   : > { %p753_p7 = pneg %p752_p5  ;;  %p757_p2 = por %p756_p1, %p755_p9 }
  0x3d   : > { %p759_p6 = por %p758_p4, %p757_p2 }
  0x3f   : > { %p760_p8 = pnand %p759_p6, %p753_p7 }
  0x41   : > { %763 = shalt.err (!%p760_p8)
}
  0x42   : > { %s764_s26 = scalar_lea.vmem %s1011_s18, 128  ;;  %s870_s21 = smov [#allocation3]  }
  0x43   : > { %p765_p12 = scmp.ne.s32.totalorder %s1011_s18, %s764_s26  ;;  %s769_s4 = sshll.u32 %s870_s21, 4  ;;  %s770_s4 = int_to_ptr.vmem [resolvable:$false] %s769_s4 }
  0x44   : > { %s771_s6 = scalar_lea.vmem %s770_s4, 256  ;;  %p772_p5 = scmp.lt.s32.totalorder %s1011_s18, %s770_s4 }
  0x45   : > { %p767_p11 = pnand %p765_p12, %p751_p3  ;;  %p773_p9 = scmp.lt.s32.totalorder %s771_s6, %s764_s26 }
  0x47   : > { %p768_p0 = pneg %p767_p11  ;;  %p774_p1 = por %p773_p9, %p772_p5 }
  0x49   : > { %p775_p2 = pnand %p774_p1, %p768_p0 }
  0x4b   : > { %778 = shalt.err (!%p775_p2)
}
  0x4c   : > { %635 = dma.hbm_to_vmem [thread:$0]  (!%p1015_p13), %s1009_s9, 128, %s1011_s18, %s1019_s25, %s868_s10, %s868_s10, %s869_s11  }
  0x4d   : > { %p1168_p3 = scmp.ne.s32.totalorder %s1162_s24, 0 }
  0x4e   : > { %s1053_s30 = sand.u32 (!%p1168_p3), 1, %s849_s13   ;;  %p1169_p7 = scmp.ne.s32.totalorder (!%p1168_p3), %s1160_s22, 0 }
  0x4f   : > { %185 = sbr.rel (%p1168_p3) target bundleno = 475 (0x1db), region = 32  ;;  %s582_s29 = sshll.u32 (!%p1168_p3), %s1053_s30, 3 }
  0x50   : > { %s188_s7 = scalar_lea.sflag (!%p1168_p3), [#allocation4], %s1053_s30  ;;  %s1059_s19 = scalar_lea.vmem (!%p1168_p3), [#allocation3], %s582_s29 }
  0x56   : > { %832 = dma.done.wait (%p1169_p7), %s188_s7, 128  }
  0x57   : > { %834 = vsyncadd (%p1169_p7), %s188_s7, 4294967168  ;;  %p1170_p13 = scmp.ne.s32.totalorder %s1158_s20, 0 }
  0x59   : > { %836 = dma.done.wait (%p1170_p13), [#allocation7], 1536  }
  0x5a   : > { %838 = vsyncadd (%p1170_p13), [#allocation7], 4294965760  ;;  %v871_v0 = vmov 0   ;;  %v698_v1 = vld [vmem:[%s1059_s19] sm:$0xff]   ;;  %v699_v2 = vld [vmem:[#allocation6] sm:$0xff]   ;;  %s872_s24 = smov 64  }
  0x5b   : > { %398 = vmatprep.subr.bf16.mxu0 %v871_v0  ;;  %258 = vrot.lane.b32.xlu0 %v698_v1, %s872_s24  ;;  %v700_v3 = vld [vmem:[#allocation6 + $0x8] sm:$0xff]   ;;  %vm225_vm0 = vsmask.f32 256  ;;  %v701_v4 = vld [vmem:[#allocation6 + $0x10] sm:$0xff]   ;;  %vm224_vm1 = vcmask 516096   ;;  %vm263_vm2 = vcmask 523271  }
  0x5c   : > { %399 = vmatpush1.bf16.msra.mxu0 %v699_v2  ;;  %vm264_vm3 = vsmask.f32 7966  ;;  %vm226_vm4 = vmand %vm224_vm1, %vm225_vm0  ;;  %v702_v5 = vld [vmem:[#allocation6 + $0x18] sm:$0xff]   ;;  %v227_v6 = vld [vmem:[#allocation2] sm:$0x1]  ;;  %vm245_vm6 = vcmask 523264  }
  0x5d   : > { %400 = vmatprep.subr.bf16.mxu0 %v871_v0  ;;  %vm265_vm5 = vmand %vm263_vm2, %vm264_vm3  ;;  %v228_v7 = vsel %vm226_vm4, 0, %v227_v6  ;;  %v711_v8 = vld [vmem:[%s1059_s19] sm:$0xff]   ;;  %v266_v9 = vld [vmem:[#allocation2 + $0x8] sm:$0x80]  ;;  %vm246_vm7 = vsmask.f32 7938 }
  0x5e   : > { %v703_v10 = vld [vmem:[#allocation6 + $0x20] sm:$0xff]   ;;  %229 = vst [vmem:[#allocation2] sm:$0x1] %v228_v7  ;;  %v267_v11 = vsel %vm265_vm5, 0, %v266_v9  ;;  %v712_v12 = vld [vmem:[%s1059_s19] sm:$0xff]   ;;  %v238_v13 = vshrl.u32 %v711_v8, 16  ;;  %vm247_vm9 = vmand %vm245_vm6, %vm246_vm7 }
  0x5f   : > { %v241_v14 = vshll.u32 %v711_v8, 16  ;;  %268 = vst [vmem:[#allocation2 + $0x8] sm:$0x80] %v267_v11  ;;  %v277_v15 = vshrl.u32 %v712_v12, 16  ;;  %v279_v16 = vshll.u32 %v712_v12, 16  ;;  %v704_v18 = vld [vmem:[#allocation6 + $0x28] sm:$0xff]  }
  0x60   : > { %401 = vmatpush1.bf16.msra.mxu0 %v700_v3  ;;  %v240_v17 = vrot.slane %v238_v13, 7  ;;  %vm284_vm8 = vsmask.f32 7424  ;;  %v705_v23 = vld [vmem:[#allocation6 + $0x30] sm:$0xff]   ;;  %v706_v27 = vld [vmem:[#allocation6 + $0x38] sm:$0xff]   ;;  %v707_v28 = vld [vmem:[#allocation6 + $0x40] sm:$0xff]  }
  0x61   : > { %402 = vmatprep.subr.bf16.mxu0 %v871_v0  ;;  %v281_v19 = vrot.slane %v279_v16, 1  ;;  %vm285_vm10 = vmand %vm245_vm6, %vm284_vm8  ;;  %v708_v29 = vld [vmem:[#allocation6 + $0x48] sm:$0xff]   ;;  %v709_v30 = vld [vmem:[#allocation6 + $0x50] sm:$0xff]   ;;  %vm261_vm11 = vcmask 1048064   ;;  %s614_s10 = sshll.u32 %s857_s15, 7  ;;  %s217_s11 = scalar_lea.vmem [#allocation8], %s582_s29 }
  0x62   : > { %v243_v20 = vor.u32 %v241_v14, %v240_v17  ;;  %v710_v31 = vld [vmem:[#allocation6 + $0x58] sm:$0xff]   ;;  %v588_v34 = vld [vmem:[%s1152_s2] ss:$0 sm:$0xff]  ;;  %s479_s9 = sshll.u32 %s217_s11, 4  ;;  %s1097_s8 = scalar_lea.hbm %s1153_s3, %s614_s10  ;;  %s1099_s9 = int_to_ptr.vmem [resolvable:$true] %s479_s9 }
  0x63   : > { %v282_v21 = vor.u32 %v281_v19, %v277_v15  ;;  %s464_s26 = scalar_lea.sflag [#allocation5], %s1053_s30  ;;  %s779_s15 = scalar_lea.vmem %s1099_s9, 128 }
  0x64   : > { %403 = vmatpush1.bf16.msra.mxu0 %v701_v4  ;;  %p780_p4 = scmp.ne.s32.totalorder %s1099_s9, %s779_s15  ;;  %s873_s21 = smov [#allocation8]  }
  0x65   : > { %404 = vmatprep.subr.bf16.mxu0 %v871_v0  ;;  %v248_v22 = vld [vmem:[#allocation2] sm:$0xff]  ;;  %s783_s4 = sshll.u32 %s873_s21, 4  ;;  %s784_s4 = int_to_ptr.vmem [resolvable:$false] %s783_s4 }
  0x66   : > { %v249_v24 = vsel %vm247_vm9, %v243_v20, %v248_v22  ;;  %v286_v25 = vld [vmem:[#allocation2 + $0x8] sm:$0xff]  ;;  %p781_p6 = pnand %p780_p4, %p994_p10  ;;  %s785_s6 = scalar_lea.vmem %s784_s4, 256 }
  0x67   : > { %250 = vst [vmem:[#allocation2] sm:$0xff] %v249_v24  ;;  %v287_v26 = vsel %vm285_vm10, %v282_v21, %v286_v25  ;;  %p786_p12 = scmp.lt.s32.totalorder %s1099_s9, %s784_s4  ;;  %p787_p11 = scmp.lt.s32.totalorder %s785_s6, %s779_s15 }
  0x68   : > { %405 = vmatpush1.bf16.msra.mxu0 %v702_v5  ;;  %288 = vst [vmem:[#allocation2 + $0x8] sm:$0xff] %v287_v26  ;;  %601 = vmatprep.mubr.msk.bf16.mxu0 %vm245_vm6, %v287_v26  ;;  %p782_p8 = pneg %p781_p6 }
  0x69   : > { %406 = vmatprep.subr.bf16.mxu0 %v871_v0  ;;  %p788_p0 = por %p787_p11, %p786_p12 }
  0x6b   : > { %p789_p5 = pnand %p788_p0, %p782_p8 }
  0x6c   : > { %407 = vmatpush1.bf16.msra.mxu0 %v703_v10 }
  0x6d   : > { %408 = vmatprep.subr.bf16.mxu0 %v871_v0 }
  0x70   : > { %409 = vmatpush1.bf16.msra.mxu0 %v704_v18 }
  0x71   : > { %410 = vmatprep.subr.bf16.mxu0 %v871_v0 }
  0x74   : > { %411 = vmatpush1.bf16.msra.mxu0 %v705_v23 }
  0x75   : > { %412 = vmatprep.subr.bf16.mxu0 %v871_v0 }
  0x78   : > { %413 = vmatpush1.bf16.msra.mxu0 %v706_v27 }
  0x79   : > { %414 = vmatprep.subr.bf16.mxu0 %v871_v0 }
  0x7c   : > { %415 = vmatpush1.bf16.msra.mxu0 %v707_v28 }
  0x7d   : > { %416 = vmatprep.subr.bf16.mxu0 %v871_v0 }
  0x80   : > { %417 = vmatpush1.bf16.msra.mxu0 %v708_v29 }
  0x81   : > { %418 = vmatprep.subr.bf16.mxu0 %v871_v0 }
  0x84   : > { %419 = vmatpush1.bf16.msra.mxu0 %v709_v30 }
  0x85   : > { %420 = vmatprep.subr.bf16.mxu0 %v871_v0 }
  0x88   : > { %421 = vmatpush1.bf16.msra.mxu0 %v710_v31 }
  0xcd   : > { %v259_v32 = vpop.permute.xlu0 %258 }
  0xce   : > { %262 = vst.msk [vmem:[#allocation2] sm:$0xff] %vm261_vm11, %v259_v32 }
  0xd5   : > { %v289_v33 = vld [vmem:[#allocation2] sm:$0xff] }
  0xd6   : > { %431 = vmatmul.mubr.bf16.vlgmr.msra.gmra.mrb[0].mxu0 %v289_v33 }
 0x1a9   : > { %v432_v35 = vpop.f32.mrb[0].mxu0 }
 0x1aa   : > { %v433_v36 = vadd.f32 %v588_v34, %v432_v35  ;;  %v434_v37 = vpop.f32.mrb[1].mxu0 }
 0x1ab   : > { %v435_v38 = vpop.f32.mrb[2].mxu0 }
 0x1ac   : > { %v602_v39 = vmul.f32 -1.442695, %v433_v36  ;;  %v436_v40 = vadd.f32 %v588_v34, %v435_v38  ;;  %v437_v41 = vpop.f32.mrb[3].mxu0 }
 0x1ae   : > { %713 = vpow2.f32 %v602_v39  ;;  %v603_v42 = vmul.f32 -1.442695, %v436_v40 }
 0x1b0   : > { %715 = vpow2.f32 %v603_v42 }
 0x1b8   : > { %v714_v43 = vpop.eup %713 }
 0x1b9   : > { %v445_v44 = vadd.f32 1.0, %v714_v43 }
 0x1ba   : > { %v716_v45 = vpop.eup %715 }
 0x1bb   : > { %717 = vrcp.f32 %v445_v44  ;;  %v446_v46 = vadd.f32 1.0, %v716_v45 }
 0x1bd   : > { %719 = vrcp.f32 %v446_v46 }
 0x1c5   : > { %v718_v47 = vpop.eup %717 }
 0x1c6   : > { %v451_v49 = vmul.f32 %v718_v47, %v433_v36 }
 0x1c7   : > { %v720_v48 = vpop.eup %719 }
 0x1c8   : > { %v452_v50 = vmul.f32 %v720_v48, %v436_v40 }
 0x1ca   : > { %v618_v51 = vpack.c.bf16 %v452_v50, %v451_v49 }
 0x1cc   : > { %619 = vst [vmem:[%s217_s11] sm:$0xff] %v618_v51  }
 0x1cd   : > { %792 = shalt.err (!%p789_p5)
}
 0x1ce   : > { %s793_s29 = scalar_lea.hbm %s1097_s8, 128  ;;  %s797_s20 = scalar_lea.hbm %s1153_s3, 256 }
 0x1cf   : > { %p794_p9 = scmp.ne.s32.totalorder %s1097_s8, %s793_s29  ;;  %p798_p3 = scmp.lt.u32.totalorder %s1097_s8, %s1153_s3 }
 0x1d0   : > { %p799_p7 = scmp.lt.u32.totalorder %s797_s20, %s793_s29  ;;  %p801_p4 = scmp.lt.u32.totalorder %s793_s29, %s1097_s8 }
 0x1d1   : > { %p795_p1 = pnand %p794_p9, %p994_p10 }
 0x1d2   : > { %p800_p13 = por %p799_p7, %p798_p3 }
 0x1d3   : > { %p796_p2 = pneg %p795_p1 }
 0x1d4   : > { %p802_p6 = por %p801_p4, %p800_p13 }
 0x1d6   : > { %p803_p8 = pnand %p802_p6, %p796_p2 }
 0x1d8   : > { %806 = shalt.err (!%p803_p8)
}
 0x1d9   : > { %s874_s11 = smov 4  }
 0x1da   : > { %626 = dma.vmem_to_hbm [thread:$0]  (%p994_p10), %s1099_s9, 128, %s1097_s8, %s464_s26, %s872_s24, %s872_s24, %s874_s11  }
 0x1db PF: > { %s494_s18 = sand.u32 1, %s845_s12   ;;  %p1171_p12 = scmp.ne.s32.totalorder %s1161_s23, 0 }
 0x1dc   : > { %p1172_p11 = scmp.ge.s32.totalorder %s865_s17, 2  ;;  %s495_s25 = scalar_lea.sflag [#allocation5], %s494_s18 }
 0x1de   : > { %p637_p0 = pnand %p1172_p11, %p1171_p12 }
 0x1e0   : > { %840 = dma.done.wait (!%p637_p0), %s495_s25, 128  }
 0x1e1   : > { %842 = vsyncadd (!%p637_p0), %s495_s25, 4294967168  ;;  %s20_s17 = sadd.s32 1, %s865_s17   ;;  %s1173_s12 = smov %s849_s13 }
 0x1e2   : > { %p17_p5 = scmp.ge.s32.totalorder %s20_s17, 4   ;;  %s1174_s13 = smov %s853_s14 }
 0x1e3   : > { %s1175_s14 = smov %s1003_s5  ;;  %s1176_s15 = smov %s861_s16 }
 0x1e4   : > { %s1177_s16 = smov %s1179_s28  ;;  %19 = sbr.rel (!%p17_p5) target bundleno = 7 (0x7), region = 85 }
 0x1eb   :  { %500 = vsyncpa [#allocation4], 1 }
 0x1ec   :  { %502 = vsyncpa [#allocation4 + $0x1], 1 }
 0x1ed   :  { %503 = vsyncpa [#allocation7], 1 }
 0x1ee   :  { %504 = vsyncpa [#allocation5], 1 }
 0x1ef   :  { %506 = vsyncpa [#allocation5 + $0x1], 1 }

</bundles_post_ra>
